<compile_context>
chip_gen: v7x
topology: tpu7x:2x2x1
jax: 0.10.0
libtpu: 0.0.40
codegen_flags: <defaults>
</compile_context>

<pallas_src>
import jax
import jax.numpy as jnp
from jax.experimental import pallas as pl
from jax.experimental.pallas import tpu as pltpu

_LANE = 128
_SUBLANE = 8


def _l2_norm_kernel(x_ref, o_ref):
    # x_ref: (C, tile_r, 128) block of the input in its native dtype.
    # o_ref: (tile_r, 128) float32 block: L2 norm over the C axis.
    x = x_ref[...].astype(jnp.float32)
    o_ref[...] = jnp.sqrt(jnp.sum(x * x, axis=0))


def _choose_tile_r(C: int, R0: int, itemsize: int, target_bytes: int = 2 << 20) -> int:
    """Pick a sublane-aligned row-tile: ~target_bytes input blocks, >=2 grid steps."""
    cap = target_bytes // max(1, C * _LANE * itemsize)
    cap = max(_SUBLANE, (cap // _SUBLANE) * _SUBLANE)
    if R0 >= 2 * _SUBLANE:
        # keep at least 2 grid steps so both v7x TensorCores get work
        half = max(_SUBLANE, (pl.cdiv(R0, 2) // _SUBLANE) * _SUBLANE)
        return min(cap, half)
    return _SUBLANE


def _reference(x_init: jax.Array) -> jax.Array:
    # Pure-JAX reference of the PyTorch construction (also the small-input path).
    norm = jnp.sqrt(jnp.sum(x_init.astype(jnp.float32) ** 2, axis=0))  # (D,H,W)
    real = norm[None]                                                  # (1,D,H,W)
    imag = jnp.zeros_like(real)
    return jnp.stack([real, imag], axis=1).astype(jnp.float32)         # (1,2,D,H,W)


def interface_x(x_init: jax.Array, *,
                force_pallas: bool = False,
                min_pallas_elems: int = 1 << 16) -> jax.Array:
    """Builds the Interface_X parameter (== its forward output).

    x_init: (C, D, H, W) array (any float dtype).
    returns: (1, 2, D, H, W) float32 array.
    """
    C, D, H, W = x_init.shape
    M = D * H * W

    # TPU has no f64 vector path; the final result is .float() anyway.
    if x_init.dtype == jnp.float64:
        x_init = x_init.astype(jnp.float32)

    # Kilobyte-scale inputs: an XLA-fused reduction beats pallas_call overhead.
    if not force_pallas and C * M < min_pallas_elems:
        return _reference(x_init)

    itemsize = jnp.dtype(x_init.dtype).itemsize
    R0 = pl.cdiv(M, _LANE)                      # rows of 128 before tile padding
    tile_r = _choose_tile_r(C, R0, itemsize)
    R = pl.cdiv(R0, tile_r) * tile_r            # padded row count
    grid_r = R // tile_r

    # TODO(synk): for very large C the (C, tile_r, 128) block can exceed scoped
    # VMEM; a K-style reduction grid axis over C would be needed there.

    x_flat = x_init.reshape(C, M)
    pad = R * _LANE - M
    if pad:
        x_flat = jnp.pad(x_flat, ((0, 0), (0, pad)))
    x3 = x_flat.reshape(C, R, _LANE)

    cost = pl.CostEstimate(
        flops=3 * C * R * _LANE,                       # mul + add + sqrt-ish
        transcendentals=0,
        bytes_accessed=C * R * _LANE * itemsize + R * _LANE * 4,
    )

    norm = pl.pallas_call(
        _l2_norm_kernel,
        out_shape=jax.ShapeDtypeStruct((R, _LANE), jnp.float32),
        grid_spec=pltpu.PrefetchScalarGridSpec(
            num_scalar_prefetch=0,
            grid=(grid_r,),
            in_specs=[pl.BlockSpec((C, tile_r, _LANE), lambda i: (0, i, 0))],
            out_specs=pl.BlockSpec((tile_r, _LANE), lambda i: (i, 0)),
        ),
        compiler_params=pltpu.CompilerParams(
            dimension_semantics=("parallel",),
        ),
        cost_estimate=cost,
    )(x3)

    # (R,128) -> drop padding -> (1, D, H, W); zero imag channel built host-side.
    norm = norm.reshape(-1)[:M].reshape(1, D, H, W)
    imag = jnp.zeros_like(norm)
    # stack at axis=1 == view_as_real(...).permute(0,4,1,2,3)
    return jnp.stack([norm, imag], axis=1).astype(jnp.float32)  # (1, 2, D, H, W)


if __name__ == "__main__":
    key = jax.random.PRNGKey(0)

    # Case 1: small shape consistent with the module (C=1, cubic spatial).
    C, D, H, W = 1, 16, 16, 16
    x_init = jax.random.normal(key, (C, D, H, W), dtype=jnp.float32)
    out = jax.block_until_ready(interface_x(x_init, force_pallas=True))
    ref = _reference(x_init)
    assert out.shape == (1, 2, D, H, W), out.shape
    assert out.dtype == jnp.float32
    assert jnp.allclose(out, ref, atol=1e-5, rtol=1e-5), "mismatch vs reference (case 1)"

    # Case 2: C > 1 and a spatial size that is NOT a multiple of 128 (pad path).
    C2, D2, H2, W2 = 3, 8, 12, 10
    x_init2 = jax.random.normal(jax.random.PRNGKey(1), (C2, D2, H2, W2),
                                dtype=jnp.bfloat16)
    out2 = jax.block_until_ready(interface_x(x_init2, force_pallas=True))
    ref2 = _reference(x_init2)
    assert out2.shape == (1, 2, D2, H2, W2), out2.shape
    assert out2.dtype == jnp.float32
    assert jnp.allclose(out2, ref2, atol=1e-2, rtol=1e-2), "mismatch vs reference (case 2)"

    print("KERNEL_OK")
</pallas_src>

<mosaic_0001>
module attributes {stable_mosaic.version = 11 : i64} {
  func.func @_l2_norm_kernel(%arg0: i32, %arg1: memref<1x16x128xf32, #tpu.memory_space<vmem>>, %arg2: memref<16x128xf32, #tpu.memory_space<vmem>>) attributes {dimension_semantics = [#tpu.dimension_semantics<parallel>], iteration_bounds = array<i64: 2>, scalar_prefetch = 0 : i64, scratch_operands = 0 : i64, tpu.core_type = #tpu.core_type<tc>, window_params = [{transform_indices = @transform_0, window_bounds = array<i64: 1, 16, 128>}, {transform_indices = @transform_1, window_bounds = array<i64: 16, 128>}]} {
    %c0 = arith.constant 0 : index
    %c0_0 = arith.constant 0 : index
    %c0_1 = arith.constant 0 : index
    %0 = vector.load %arg1[%c0, %c0_0, %c0_1] : memref<1x16x128xf32, #tpu.memory_space<vmem>>, vector<1x16x128xf32>
    %1 = arith.mulf %0, %0 : vector<1x16x128xf32>
    %cst = arith.constant dense<0.000000e+00> : vector<16x128xf32>
    %2 = vector.multi_reduction <add>, %1, %cst [0] : vector<1x16x128xf32> to vector<16x128xf32>
    %3 = math.sqrt %2 : vector<16x128xf32>
    %c0_2 = arith.constant 0 : index
    %c0_3 = arith.constant 0 : index
    %4 = vector.load %arg2[%c0_2, %c0_3] : memref<16x128xf32, #tpu.memory_space<vmem>>, vector<16x128xf32>
    tpu.vector_store %arg2[%c0_2, %c0_3], %3 {strides = array<i32>} : memref<16x128xf32, #tpu.memory_space<vmem>>, vector<16x128xf32>,
    return
  }
  func.func @transform_0(%arg0: i32) -> (i32, i32, i32) {
    %c0_i32 = arith.constant 0 : i32
    %c0_i32_0 = arith.constant 0 : i32
    %c0_i32_1 = arith.constant 0 : i32
    return %c0_i32, %arg0, %c0_i32_0 : i32, i32, i32
  }
  func.func @transform_1(%arg0: i32) -> (i32, i32) {
    %c0_i32 = arith.constant 0 : i32
    %c0_i32_0 = arith.constant 0 : i32
    return %arg0, %c0_i32 : i32, i32
  }
}

</mosaic_0001>

<bundles_post_ra>
// kernel: tpu_custom_call.1
= control target key start
LH: loop header
LB: loop body
LE: loop exit
PB: predicated region body
PF: predicated region fallthrough
CT: control target
= control target key end

     0   :  { %6 = vsyncpa [#allocation3], 0  ;;  %s592_s0 = inlined_call_operand.hbm [shape: f32[1,32,128], index: 0, kind: input, shape index: {}]   ;;  %s593_s1 = inlined_call_operand.hbm [shape: f32[32,128], index: 1, kind: output, shape index: {}]  }
   0x1   :  { %8 = vsyncpa [#allocation3 + $0x1], 0 }
   0x2   :  { %9 = vsyncpa [#allocation4], 0 }
   0x3   :  { %11 = vsyncpa [#allocation4 + $0x1], 0  ;;  %s430_s6 = smov 0   ;;  %s432_s7 = smov 0  }
   0x4   :  { %s434_s8 = smov 0   ;;  %s436_s9 = smov 0  }
   0x5 LB: > { %s451_s10 = sadd.s32 4294967295, %s412_s9   ;;  %s246_s11 = sadd.s32 4294967294, %s412_s9   ;;  %s412_s9 = sphi %s436_s9, %s606_s9   ;;  %s408_s8 = sphi %s434_s8, %s605_s8   ;;  %s404_s7 = sphi %s432_s7, %s604_s7   ;;  %s400_s6 = sphi %s430_s6, %s603_s6  }
   0x6   : > { %s455_s12 = sadd.s32 1, %s412_s9   ;;  %s24_s13 = sadd.s32 1, %s408_s8 }
   0x7   : > { %s21_s14 = ssub.s32 %s412_s9, %s455_s12  ;;  %p31_p0 = scmp.ne.s32.totalorder %s408_s8, %s404_s7 }
   0x8   : > { %p22_p1 = scmp.eq.s32.totalorder %s21_s14, 0  ;;  %p32_p2 = scmp.eq.s32.totalorder %s412_s9, 0 }
   0x9   : > { %p37_p3 = scmp.ne.s32.totalorder %s404_s7, %s400_s6  ;;  %p38_p4 = scmp.eq.s32.totalorder %s451_s10, 0 }
   0xa   : > { %s467_s15 = scalar_select %p22_p1, %s408_s8, %s24_s13  }
   0xb   : > { %p469_p5 = por %p32_p2, %p31_p0  ;;  %p473_p6 = por %p38_p4, %p37_p3 }
   0xc   : > { %p61_p7 = scmp.eq.s32.totalorder %s451_s10, 1  ;;  %p67_p8 = scmp.eq.s32.totalorder %s246_s11, 1 }
   0xd   : > { %p274_p10 = scmp.lt.s32.totalorder %s412_s9, 2  ;;  %s87_s20 = sand.u32 1, %s408_s8  }
   0xe   : > { %p480_p11 = por %p61_p7, %p31_p0  ;;  %p484_p12 = por %p67_p8, %p37_p3 }
   0xf   : > { %s260_s21 = sshll.u32 %s412_s9, 8  ;;  %s249_s22 = sshll.u32 %s87_s20, 4 }
  0x10   : > { %s597_s18 = scalar_select %p480_p11, 1, 0 }
  0x11   : > { %s598_s19 = scalar_select %p484_p12, 1, 0 }
  0x12   : > { %s493_s25 = scalar_lea.hbm %s592_s0, %s260_s21  ;;  %s91_s26 = scalar_lea.vmem [#allocation2], %s249_s22 }
  0x13   : > { %s98_s27 = sshll.u32 %s91_s26, 4  ;;  %p497_p13 = pnand %p274_p10, %p469_p5  ;;  %s501_s27 = int_to_ptr.vmem [resolvable:$true] %s98_s27 }
  0x14   : > { %s503_s29 = scalar_lea.sflag [#allocation3], %s87_s20  ;;  %s316_s30 = scalar_lea.hbm %s493_s25, 256 }
  0x15   : > { %p317_p0 = scmp.ne.s32.totalorder %s493_s25, %s316_s30  ;;  %p318_p1 = pneg %p497_p13 }
  0x16   : > { %s321_s4 = scalar_lea.hbm %s592_s0, 512  ;;  %p322_p4 = scmp.lt.u32.totalorder %s493_s25, %s592_s0 }
  0x17   : > { %p319_p2 = pnand %p318_p1, %p317_p0  ;;  %p323_p5 = scmp.lt.u32.totalorder %s321_s4, %s316_s30 }
  0x18   : > { %p325_p8 = scmp.lt.u32.totalorder %s316_s30, %s493_s25 }
  0x19   : > { %p320_p3 = pneg %p319_p2  ;;  %p324_p7 = por %p323_p5, %p322_p4 }
  0x1b   : > { %p326_p10 = por %p325_p8, %p324_p7 }
  0x1d   : > { %p327_p9 = pnand %p326_p10, %p320_p3 }
  0x1f   : > { %330 = shalt.err (!%p327_p9)
}
  0x20   : > { %s331_s13 = scalar_lea.vmem %s501_s27, 256  ;;  %s414_s14 = smov [#allocation2]  }
  0x21   : > { %p332_p0 = scmp.ne.s32.totalorder %s501_s27, %s331_s13  ;;  %s336_s16 = sshll.u32 %s414_s14, 4  ;;  %s337_s16 = int_to_ptr.vmem [resolvable:$false] %s336_s16 }
  0x22   : > { %s338_s20 = scalar_lea.vmem %s337_s16, 512  ;;  %p339_p11 = scmp.lt.s32.totalorder %s501_s27, %s337_s16 }
  0x23   : > { %p334_p2 = pnand %p332_p0, %p318_p1  ;;  %p340_p4 = scmp.lt.s32.totalorder %s338_s20, %s331_s13 }
  0x25   : > { %p335_p12 = pneg %p334_p2  ;;  %p341_p5 = por %p340_p4, %p339_p11 }
  0x27   : > { %p342_p7 = pnand %p341_p5, %p335_p12 }
  0x29   : > { %345 = shalt.err (!%p342_p7)
}
  0x2a   : > { %s415_s21 = smov 128   ;;  %s416_s22 = smov 8  }
  0x2b   : > { %269 = dma.hbm_to_vmem [thread:$0]  (!%p497_p13), %s493_s25, 256, %s501_s27, %s503_s29, %s415_s21, %s415_s21, %s416_s22  }
  0x2c   : > { %p252_p9 = scmp.ge.s32.totalorder %s412_s9, 1  ;;  %p106_p1 = scmp.lt.s32.totalorder %s412_s9, 3 }
  0x2e   : > { %p107_p3 = pnand %p252_p9, %p106_p1 }
  0x2f   : > { %s534_s23 = sand.u32 (!%p107_p3), 1, %s404_s7  }
  0x30   : > { %110 = sbr.rel (%p107_p3) target bundleno = 90 (0x5a), region = 24  ;;  %s253_s24 = sshll.u32 (!%p107_p3), %s534_s23, 4 }
  0x31   : > { %s113_s26 = scalar_lea.sflag (!%p107_p3), [#allocation3], %s534_s23  ;;  %s116_s30 = scalar_lea.vmem (!%p107_p3), [#allocation2], %s253_s24 }
  0x37   : > { %391 = dma.done.wait (%p473_p6), %s113_s26, 256  }
  0x38   : > { %393 = vsyncadd (%p473_p6), %s113_s26, 4294967040  ;;  %v137_v0 = vld [vmem:[%s116_s30] sm:$0xff]  ;;  %v138_v1 = vld [vmem:[%s116_s30 + $0x8] sm:$0xff]  ;;  %s134_s25 = scalar_lea.vmem [#allocation5], %s253_s24  ;;  %s261_s28 = sshll.u32 %s451_s10, 8 }
  0x39   : > { %v139_v2 = vmul.f32 %v137_v0, %v137_v0  ;;  %v140_v3 = vmul.f32 %v138_v1, %v138_v1  ;;  %s173_s27 = sshll.u32 %s134_s25, 4  ;;  %s548_s2 = scalar_lea.hbm %s593_s1, %s261_s28  ;;  %s543_s27 = int_to_ptr.vmem [resolvable:$true] %s173_s27 }
  0x3a   : > { %s160_s10 = scalar_lea.sflag [#allocation4], %s534_s23  ;;  %s346_s3 = scalar_lea.vmem %s543_s27, 256 }
  0x3b   : > { %312 = vrsqrt.f32 %v139_v2  ;;  %vm145_vm0 = vcmp.eq.f32.partialorder %v139_v2, inf  ;;  %v148_v5 = vand.u32 2147483648, %v139_v2  ;;  %vm147_vm1 = vcmp.eq.f32.partialorder %v139_v2, 0.0  ;;  %p347_p6 = scmp.ne.s32.totalorder %s543_s27, %s346_s3  ;;  %p600_p11 = scmp.ne.s32.totalorder %s597_s18, 0 }
  0x3c   : > { %314 = vrsqrt.f32 %v140_v3  ;;  %vm152_vm2 = vcmp.eq.f32.partialorder %v140_v3, inf  ;;  %v155_v8 = vand.u32 2147483648, %v140_v3  ;;  %vm154_vm3 = vcmp.eq.f32.partialorder %v140_v3, 0.0  ;;  %s417_s4 = smov [#allocation5]  }
  0x3d   : > { %p348_p12 = pnand %p347_p6, %p600_p11  ;;  %s350_s5 = sshll.u32 %s417_s4, 4  ;;  %s351_s5 = int_to_ptr.vmem [resolvable:$false] %s350_s5 }
  0x3e   : > { %s352_s11 = scalar_lea.vmem %s351_s5, 512  ;;  %p353_p8 = scmp.lt.s32.totalorder %s543_s27, %s351_s5 }
  0x3f   : > { %p349_p13 = pneg %p348_p12  ;;  %p354_p10 = scmp.lt.s32.totalorder %s352_s11, %s346_s3 }
  0x41   : > { %p355_p0 = por %p354_p10, %p353_p8 }
  0x43   : > { %p356_p2 = pnand %p355_p0, %p349_p13 }
  0x45   : > { %v313_v4 = vpop.eup %312 }
  0x46   : > { %v315_v6 = vpop.eup %314  ;;  %v144_v7 = vmul.f32 %v313_v4, %v139_v2 }
  0x47   : > { %v151_v9 = vmul.f32 %v315_v6, %v140_v3 }
  0x48   : > { %v146_v10 = vsel %vm145_vm0, %v139_v2, %v144_v7 }
  0x49   : > { %v149_v11 = vsel %vm147_vm1, %v148_v5, %v146_v10  ;;  %v153_v12 = vsel %vm152_vm2, %v140_v3, %v151_v9 }
  0x4a   : > { %157 = vst [vmem:[%s134_s25] sm:$0xff] %v149_v11  ;;  %v156_v13 = vsel %vm154_vm3, %v155_v8, %v153_v12 }
  0x4b   : > { %158 = vst [vmem:[%s134_s25 + $0x8] sm:$0xff] %v156_v13 }
  0x4c   : > { %359 = shalt.err (!%p356_p2)
}
  0x4d   : > { %s360_s13 = scalar_lea.hbm %s548_s2, 256  ;;  %s364_s20 = scalar_lea.hbm %s593_s1, 512 }
  0x4e   : > { %p361_p4 = scmp.ne.s32.totalorder %s548_s2, %s360_s13  ;;  %p365_p9 = scmp.lt.u32.totalorder %s548_s2, %s593_s1 }
  0x4f   : > { %p366_p1 = scmp.lt.u32.totalorder %s364_s20, %s360_s13  ;;  %p368_p6 = scmp.lt.u32.totalorder %s360_s13, %s548_s2 }
  0x50   : > { %p362_p5 = pnand %p361_p4, %p600_p11 }
  0x51   : > { %p367_p3 = por %p366_p1, %p365_p9 }
  0x52   : > { %p363_p7 = pneg %p362_p5 }
  0x53   : > { %p369_p12 = por %p368_p6, %p367_p3 }
  0x55   : > { %p370_p13 = pnand %p369_p12, %p363_p7 }
  0x57   : > { %373 = shalt.err (!%p370_p13)
}
  0x58   : > { %s418_s24 = smov 128   ;;  %s419_s26 = smov 8  }
  0x59   : > { %264 = dma.vmem_to_hbm [thread:$0]  (%p600_p11), %s543_s27, 256, %s548_s2, %s160_s10, %s418_s24, %s418_s24, %s419_s26  }
  0x5a PF: > { %s188_s30 = sand.u32 1, %s400_s6   ;;  %p601_p8 = scmp.ne.s32.totalorder %s598_s19, 0 }
  0x5b   : > { %p602_p10 = scmp.ge.s32.totalorder %s412_s9, 2  ;;  %s189_s25 = scalar_lea.sflag [#allocation4], %s188_s30 }
  0x5d   : > { %p271_p0 = pnand %p602_p10, %p601_p8 }
  0x5f   : > { %395 = dma.done.wait (!%p271_p0), %s189_s25, 256  }
  0x60   : > { %397 = vsyncadd (!%p271_p0), %s189_s25, 4294967040  ;;  %p14_p2 = scmp.ge.s32.totalorder %s455_s12, 4   ;;  %s603_s6 = smov %s404_s7 }
  0x61   : > { %s604_s7 = smov %s408_s8  ;;  %s605_s8 = smov %s467_s15 }
  0x62   : > { %s606_s9 = smov %s455_s12  ;;  %16 = sbr.rel (!%p14_p2) target bundleno = 5 (0x5), region = 69 }
  0x69   :  { %194 = vsyncpa [#allocation3], 1 }
  0x6a   :  { %196 = vsyncpa [#allocation3 + $0x1], 1 }
  0x6b   :  { %197 = vsyncpa [#allocation4], 1 }
  0x6c   :  { %199 = vsyncpa [#allocation4 + $0x1], 1 }

</bundles_post_ra>
